<compile_context>
chip_gen: v5e
topology: v5e:2x2
jax: 0.10.0
libtpu: 0.0.40
codegen_flags: <defaults>
</compile_context>

<pallas_src>
import functools

import jax
import jax.numpy as jnp
import numpy as np
from jax import lax
from jax.experimental import pallas as pl
from jax.experimental.pallas import tpu as pltpu


# ----------------------------------------------------------------------------
# Fused kernel (single block, whole-array VMEM operands; workload is
# launch/DMA bound, resident footprint < 1 MB, no grid/tiling needed):
#   x_ref   : raw input, (B, L) bf16
#   wc_ref  : folded even/odd conv weight, (L, 2*F) bf16
#             columns [0,F) = even pool positions, [F,2F) = odd, index l*C+c
#   w1_ref  : fc1 weight, rows permuted to l*C + c order, (F, H) bf16
#   wa_ref  : all heads' first-layer weights concatenated, (H, NA) bf16
#   wb_ref  : block-diagonal second-layer weights, (NA, OD_pad) bf16
#   b_ref   : coalesced biases [conv(F) | fc1(H) | heads_a(NA) | heads_b(OD)],
#             (1, F+H+NA+OD_pad) f32, all offsets 128-aligned
#   shared_ref : shared_features output, (B, H) f32
#   heads_ref  : concatenated head outputs (zero-padded lanes), (B, OD_pad) f32
# ----------------------------------------------------------------------------
def fused_mtcnn_kernel(x_ref, wc_ref, w1_ref, wa_ref, wb_ref, b_ref,
                       shared_ref, heads_ref, *, F, H, NA):
    # Conv1d (+ folded BN eval) for both pool positions in one matmul.
    y = jnp.dot(x_ref[...], wc_ref[...], preferred_element_type=jnp.float32)
    bc = b_ref[:, 0:F]
    # MaxPool1d(2) = max of the two 128-aligned lane halves; the per-channel
    # bias is position-independent so it is added once after the max, and
    # relu(max(a,b)) == max(relu(a),relu(b)) (monotone), so ReLU once.
    pooled = jnp.maximum(jnp.maximum(y[:, :F], y[:, F:]) + bc, 0.0)   # (B, F)

    # shared_fc: Linear + Dropout(identity) + ReLU
    b1 = b_ref[:, F:F + H]
    h = jnp.dot(pooled.astype(w1_ref.dtype), w1_ref[...],
                preferred_element_type=jnp.float32) + b1
    h = jnp.maximum(h, 0.0)
    shared_ref[...] = h.astype(shared_ref.dtype)

    # All heads fused: Linear+ReLU (concatenated) then Linear (block-diagonal).
    ba = b_ref[:, F + H:F + H + NA]
    z = jnp.dot(h.astype(wa_ref.dtype), wa_ref[...],
                preferred_element_type=jnp.float32) + ba
    z = jnp.maximum(z, 0.0)
    bb = b_ref[:, F + H + NA:]
    o = jnp.dot(z.astype(wb_ref.dtype), wb_ref[...],
                preferred_element_type=jnp.float32) + bb
    heads_ref[...] = o.astype(heads_ref.dtype)


def _vmem_spec():
    return pl.BlockSpec(memory_space=pltpu.MemorySpace.VMEM)


# ----------------------------------------------------------------------------
# One-time weight preparation (host-side numpy; NOT part of the per-call path)
# ----------------------------------------------------------------------------
def prepare_params(params, input_dim, pad=1):
    conv_w = np.asarray(params["conv_w"], np.float32)      # (C, 1, K)
    conv_b = np.asarray(params["conv_b"], np.float32)
    gamma = np.asarray(params["bn_gamma"], np.float32)
    beta = np.asarray(params["bn_beta"], np.float32)
    mean = np.asarray(params["bn_mean"], np.float32)
    var = np.asarray(params["bn_var"], np.float32)
    fc1_w = np.asarray(params["fc1_w"], np.float32)         # (H, C*L_pool)
    fc1_b = np.asarray(params["fc1_b"], np.float32)

    C, _, K = conv_w.shape
    L = input_dim
    L_conv = L + 2 * pad - K + 1                             # stride 1
    L_pool = L_conv // 2                                     # MaxPool1d(2)
    F = C * L_pool
    H = fc1_w.shape[0]

    # Fold BatchNorm(eval) + conv bias into the conv weights.
    eps = 1e-5
    s = gamma / np.sqrt(var + eps)
    t = beta - mean * s
    wc = conv_w[:, 0, :].T * s[None, :]                      # (K, C)
    bc = conv_b * s + t                                      # (C,)

    # Even/odd conv weight operating directly on raw x; boundary padding is
    # folded in as dropped zero rows.  Output feature index = l*C + c.
    W_even = np.zeros((L + 2 * pad, F), np.float32)
    W_odd = np.zeros((L + 2 * pad, F), np.float32)
    for l in range(L_pool):
        for k in range(K):
            W_even[2 * l + k, l * C:(l + 1) * C] += wc[k]
            W_odd[2 * l + 1 + k, l * C:(l + 1) * C] += wc[k]
    W_cat = np.concatenate([W_even[pad:pad + L], W_odd[pad:pad + L]], axis=1)
    b_conv = np.tile(bc, L_pool)                             # (F,)

    # fc1 weight rows permuted from PyTorch's c*L_pool + l order to l*C + c
    # (replaces any in-kernel activation transpose).
    w1_perm = fc1_w.T.reshape(C, L_pool, H).transpose(1, 0, 2).reshape(F, H)

    # Fuse all heads into two lane-dense matmuls.
    heads = params["heads"]
    n_heads = len(heads)
    NA = 64 * n_heads
    NA_pad = ((NA + 127) // 128) * 128
    ods = tuple(int(np.asarray(hp["wb"]).shape[0]) for hp in heads)
    sum_od = sum(ods)
    OD_pad = ((sum_od + 127) // 128) * 128

    wa_cat = np.zeros((H, NA_pad), np.float32)
    ba_cat = np.zeros((NA_pad,), np.float32)
    wb_blk = np.zeros((NA_pad, OD_pad), np.float32)
    bb_cat = np.zeros((OD_pad,), np.float32)
    off = 0
    for i, hp in enumerate(heads):
        wa = np.asarray(hp["wa"], np.float32)                # (64, H)
        ba = np.asarray(hp["ba"], np.float32)
        wb = np.asarray(hp["wb"], np.float32)                # (od, 64)
        bb = np.asarray(hp["bb"], np.float32)
        od = ods[i]
        wa_cat[:, i * 64:(i + 1) * 64] = wa.T
        ba_cat[i * 64:(i + 1) * 64] = ba
        wb_blk[i * 64:(i + 1) * 64, off:off + od] = wb.T
        bb_cat[off:off + od] = bb
        off += od

    # Coalesced bias buffer; all offsets (0, F, F+H, F+H+NA_pad) 128-aligned.
    bias_all = np.concatenate([b_conv, fc1_b, ba_cat, bb_cat])[None, :]

    prep = {
        "w_conv": jnp.asarray(W_cat, jnp.bfloat16),          # (L, 2F)
        "w1": jnp.asarray(w1_perm, jnp.bfloat16),             # (F, H)
        "wa": jnp.asarray(wa_cat, jnp.bfloat16),              # (H, NA_pad)
        "wb": jnp.asarray(wb_blk, jnp.bfloat16),               # (NA_pad, OD_pad)
        "bias": jnp.asarray(bias_all, jnp.float32),            # (1, TB)
    }
    meta = {"L": L, "F": F, "H": H, "NA_pad": NA_pad, "OD_pad": OD_pad,
            "ods": ods}
    return prep, meta


# ----------------------------------------------------------------------------
# Per-call forward: cast x -> bf16, one pallas_call, slice head outputs.
# ----------------------------------------------------------------------------
def mtcnn_forward(x, prep, *, meta, reg_list):
    B, L = x.shape
    assert L == meta["L"], "input_dim mismatch with prepared params"
    F, H, NA, OD_pad = meta["F"], meta["H"], meta["NA_pad"], meta["OD_pad"]

    flops = 2 * B * (L * 2 * F + F * H + H * NA + NA * OD_pad)
    bytes_accessed = (B * L * 2 + L * 2 * F * 2 + F * H * 2 + H * NA * 2
                      + NA * OD_pad * 2 + (F + H + NA + OD_pad) * 4
                      + B * (H + OD_pad) * 4)

    shared, heads_out = pl.pallas_call(
        functools.partial(fused_mtcnn_kernel, F=F, H=H, NA=NA),
        out_shape=(jax.ShapeDtypeStruct((B, H), jnp.float32),
                   jax.ShapeDtypeStruct((B, OD_pad), jnp.float32)),
        in_specs=[_vmem_spec()] * 6,
        out_specs=(_vmem_spec(), _vmem_spec()),
        cost_estimate=pl.CostEstimate(flops=flops, transcendentals=0,
                                      bytes_accessed=bytes_accessed),
    )(x.astype(jnp.bfloat16), prep["w_conv"], prep["w1"],
      prep["wa"], prep["wb"], prep["bias"])

    outputs = {}
    off = 0
    for reg, od in zip(reg_list, meta["ods"]):
        outputs[reg] = heads_out[:, off:off + od]
        off += od
    return outputs, shared


# ----------------------------------------------------------------------------
# Deterministic parameter init (mimics the module's Dirichlet init:
# sample ~ Dir(alpha=1) == normalized Gamma(1), then (sample - 1/n) * 0.01)
# ----------------------------------------------------------------------------
def _dirichlet_init(key, shape, scale=0.01):
    n = 1
    for d in shape:
        n *= d
    g = jax.random.gamma(key, 1.0, (n,))
    d = g / jnp.sum(g)
    return ((d - 1.0 / n) * scale).reshape(shape).astype(jnp.float32)


def init_params(key, input_dim, output_dims, conv_cfg=(64, 5, 1, 1), hidden_dim=128):
    C, K, stride, pad = conv_cfg
    L_conv = (input_dim + 2 * pad - K) // stride + 1
    L_pool = L_conv // 2
    F = C * L_pool
    keys = jax.random.split(key, 4 + len(output_dims))
    params = {
        "conv_w": _dirichlet_init(keys[0], (C, 1, K)),
        "conv_b": _dirichlet_init(keys[1], (C,)),
        "bn_gamma": jnp.ones((C,), jnp.float32),
        "bn_beta": jnp.zeros((C,), jnp.float32),
        "bn_mean": jnp.zeros((C,), jnp.float32),
        "bn_var": jnp.ones((C,), jnp.float32),
        "fc1_w": _dirichlet_init(keys[2], (hidden_dim, F)),
        "fc1_b": _dirichlet_init(keys[3], (hidden_dim,)),
        "heads": [],
    }
    for i, od in enumerate(output_dims):
        hk = jax.random.split(keys[4 + i], 4)
        params["heads"].append({
            "wa": _dirichlet_init(hk[0], (64, hidden_dim)),
            "ba": _dirichlet_init(hk[1], (64,)),
            "wb": _dirichlet_init(hk[2], (od, 64)),
            "bb": _dirichlet_init(hk[3], (od,)),
        })
    return params


# ----------------------------------------------------------------------------
# Pure-JAX reference (independent path via lax.conv) for correctness check
# ----------------------------------------------------------------------------
def reference_forward(x, params, reg_list):
    B, L = x.shape
    conv_w = params["conv_w"]
    C, _, K = conv_w.shape
    y = lax.conv_general_dilated(
        x[:, None, :], conv_w, window_strides=(1,), padding=((1, 1),),
        dimension_numbers=("NCH", "OIH", "NCH"))
    y = y + params["conv_b"][None, :, None]
    eps = 1e-5
    s = params["bn_gamma"] / jnp.sqrt(params["bn_var"] + eps)
    y = (y - params["bn_mean"][None, :, None]) * s[None, :, None] \
        + params["bn_beta"][None, :, None]
    y = jnp.maximum(y, 0.0)
    Lc = y.shape[-1]
    Lp = Lc // 2
    y = y[:, :, : Lp * 2].reshape(B, C, Lp, 2).max(-1)
    feat = y.reshape(B, C * Lp)
    h = jnp.maximum(feat @ params["fc1_w"].T + params["fc1_b"], 0.0)
    outs = {}
    for reg, hp in zip(reg_list, params["heads"]):
        z = jnp.maximum(h @ hp["wa"].T + hp["ba"], 0.0)
        outs[reg] = z @ hp["wb"].T + hp["bb"]
    return outs, h


if __name__ == "__main__":
    B = 8
    input_dim = 34            # conv out 32, pooled 16, features = 64*16 = 1024
    hidden_dim = 128
    output_dims = [4, 6]
    reg_list = ["reg_a", "reg_b"]

    key = jax.random.PRNGKey(0)
    kx, kp = jax.random.split(key)
    x = jax.random.normal(kx, (B, input_dim), jnp.float32)
    params = init_params(kp, input_dim, output_dims, (64, 5, 1, 1), hidden_dim)

    # One-time weight folding (outside the per-call jitted path).
    prep, meta = prepare_params(params, input_dim)

    fwd = jax.jit(functools.partial(mtcnn_forward, meta=meta,
                                    reg_list=tuple(reg_list)))
    outputs, shared = fwd(x, prep)
    jax.block_until_ready(shared)
    for r in reg_list:
        jax.block_until_ready(outputs[r])

    ref_out, ref_shared = reference_forward(x, params, reg_list)
    assert jnp.allclose(shared, ref_shared, atol=1e-4), "shared_features mismatch"
    for r in reg_list:
        assert jnp.allclose(outputs[r], ref_out[r], atol=1e-4), f"head {r} mismatch"

    print("KERNEL_OK")
</pallas_src>

<mosaic_0001>
module attributes {stable_mosaic.version = 11 : i64} {
  func.func @fused_mtcnn_kernel(%arg0: memref<8x34xbf16, #tpu.memory_space<vmem>>, %arg1: memref<34x2048xbf16, #tpu.memory_space<vmem>>, %arg2: memref<1024x128xbf16, #tpu.memory_space<vmem>>, %arg3: memref<128x128xbf16, #tpu.memory_space<vmem>>, %arg4: memref<128x128xbf16, #tpu.memory_space<vmem>>, %arg5: memref<1x1408xf32, #tpu.memory_space<vmem>>, %arg6: memref<8x128xf32, #tpu.memory_space<vmem>>, %arg7: memref<8x128xf32, #tpu.memory_space<vmem>>) attributes {dimension_semantics = [], scalar_prefetch = 0 : i64, scratch_operands = 0 : i64, tpu.core_type = #tpu.core_type<tc>} {
    %c0 = arith.constant 0 : index
    %c0_0 = arith.constant 0 : index
    %0 = vector.load %arg0[%c0, %c0_0] : memref<8x34xbf16, #tpu.memory_space<vmem>>, vector<8x34xbf16>
    %c0_1 = arith.constant 0 : index
    %c0_2 = arith.constant 0 : index
    %1 = vector.load %arg1[%c0_1, %c0_2] : memref<34x2048xbf16, #tpu.memory_space<vmem>>, vector<34x2048xbf16>
    %cst = arith.constant dense<0.000000e+00> : vector<8x2048xf32>
    %2 = tpu.matmul %0, %1, %cst {dimension_numbers = #tpu.dot_dimension_numbers<[1], [0], [0], [1], [0, 0, 1, 1], [], []>} : vector<8x34xbf16>, vector<34x2048xbf16>, vector<8x2048xf32> -> vector<8x2048xf32>
    %c0_3 = arith.constant 0 : index
    %c0_4 = arith.constant 0 : index
    %3 = vector.load %arg5[%c0_3, %c0_4] : memref<1x1408xf32, #tpu.memory_space<vmem>>, vector<1x1024xf32>
    %4 = vector.extract_strided_slice %2 {offsets = [0, 0], sizes = [8, 1024], strides = [1, 1]} : vector<8x2048xf32> to vector<8x1024xf32>
    %5 = vector.extract_strided_slice %2 {offsets = [0, 1024], sizes = [8, 1024], strides = [1, 1]} : vector<8x2048xf32> to vector<8x1024xf32>
    %6 = arith.maximumf %4, %5 : vector<8x1024xf32>
    %7 = vector.broadcast %3 : vector<1x1024xf32> to vector<8x1024xf32>
    %8 = arith.addf %6, %7 : vector<8x1024xf32>
    %cst_5 = arith.constant 0.000000e+00 : f32
    %9 = vector.broadcast %cst_5 : f32 to vector<8x1024xf32>
    %10 = arith.maximumf %8, %9 : vector<8x1024xf32>
    %c0_6 = arith.constant 0 : index
    %c1024 = arith.constant 1024 : index
    %11 = vector.load %arg5[%c0_6, %c1024] : memref<1x1408xf32, #tpu.memory_space<vmem>>, vector<1x128xf32>
    %12 = arith.truncf %10 : vector<8x1024xf32> to vector<8x1024xbf16>
    %c0_7 = arith.constant 0 : index
    %c0_8 = arith.constant 0 : index
    %13 = vector.load %arg2[%c0_7, %c0_8] : memref<1024x128xbf16, #tpu.memory_space<vmem>>, vector<1024x128xbf16>
    %cst_9 = arith.constant dense<0.000000e+00> : vector<8x128xf32>
    %14 = tpu.matmul %12, %13, %cst_9 {dimension_numbers = #tpu.dot_dimension_numbers<[1], [0], [0], [1], [0, 0, 1, 1], [], []>} : vector<8x1024xbf16>, vector<1024x128xbf16>, vector<8x128xf32> -> vector<8x128xf32>
    %15 = vector.broadcast %11 : vector<1x128xf32> to vector<8x128xf32>
    %16 = arith.addf %14, %15 : vector<8x128xf32>
    %cst_10 = arith.constant 0.000000e+00 : f32
    %17 = vector.broadcast %cst_10 : f32 to vector<8x128xf32>
    %18 = arith.maximumf %16, %17 : vector<8x128xf32>
    %c0_11 = arith.constant 0 : index
    %c0_12 = arith.constant 0 : index
    %19 = vector.load %arg6[%c0_11, %c0_12] : memref<8x128xf32, #tpu.memory_space<vmem>>, vector<8x128xf32>
    tpu.vector_store %arg6[%c0_11, %c0_12], %18 {strides = array<i32>} : memref<8x128xf32, #tpu.memory_space<vmem>>, vector<8x128xf32>,
    %c0_13 = arith.constant 0 : index
    %c1152 = arith.constant 1152 : index
    %20 = vector.load %arg5[%c0_13, %c1152] : memref<1x1408xf32, #tpu.memory_space<vmem>>, vector<1x128xf32>
    %21 = arith.truncf %18 : vector<8x128xf32> to vector<8x128xbf16>
    %c0_14 = arith.constant 0 : index
    %c0_15 = arith.constant 0 : index
    %22 = vector.load %arg3[%c0_14, %c0_15] : memref<128x128xbf16, #tpu.memory_space<vmem>>, vector<128x128xbf16>
    %cst_16 = arith.constant dense<0.000000e+00> : vector<8x128xf32>
    %23 = tpu.matmul %21, %22, %cst_16 {dimension_numbers = #tpu.dot_dimension_numbers<[1], [0], [0], [1], [0, 0, 1, 1], [], []>} : vector<8x128xbf16>, vector<128x128xbf16>, vector<8x128xf32> -> vector<8x128xf32>
    %24 = vector.broadcast %20 : vector<1x128xf32> to vector<8x128xf32>
    %25 = arith.addf %23, %24 : vector<8x128xf32>
    %cst_17 = arith.constant 0.000000e+00 : f32
    %26 = vector.broadcast %cst_17 : f32 to vector<8x128xf32>
    %27 = arith.maximumf %25, %26 : vector<8x128xf32>
    %c0_18 = arith.constant 0 : index
    %c1280 = arith.constant 1280 : index
    %28 = vector.load %arg5[%c0_18, %c1280] : memref<1x1408xf32, #tpu.memory_space<vmem>>, vector<1x128xf32>
    %29 = arith.truncf %27 : vector<8x128xf32> to vector<8x128xbf16>
    %c0_19 = arith.constant 0 : index
    %c0_20 = arith.constant 0 : index
    %30 = vector.load %arg4[%c0_19, %c0_20] : memref<128x128xbf16, #tpu.memory_space<vmem>>, vector<128x128xbf16>
    %cst_21 = arith.constant dense<0.000000e+00> : vector<8x128xf32>
    %31 = tpu.matmul %29, %30, %cst_21 {dimension_numbers = #tpu.dot_dimension_numbers<[1], [0], [0], [1], [0, 0, 1, 1], [], []>} : vector<8x128xbf16>, vector<128x128xbf16>, vector<8x128xf32> -> vector<8x128xf32>
    %32 = vector.broadcast %28 : vector<1x128xf32> to vector<8x128xf32>
    %33 = arith.addf %31, %32 : vector<8x128xf32>
    %c0_22 = arith.constant 0 : index
    %c0_23 = arith.constant 0 : index
    %34 = vector.load %arg7[%c0_22, %c0_23] : memref<8x128xf32, #tpu.memory_space<vmem>>, vector<8x128xf32>
    tpu.vector_store %arg7[%c0_22, %c0_23], %33 {strides = array<i32>} : memref<8x128xf32, #tpu.memory_space<vmem>>, vector<8x128xf32>,
    return
  }
}

</mosaic_0001>

<bundles_post_ra>
// kernel: mtcnn_forward.1
= control target key start
LH: loop header
LB: loop body
LE: loop exit
PB: predicated region body
PF: predicated region fallthrough
CT: control target
= control target key end

     0   :  { %13 = vsyncpa [#allocation3], 0  ;;  %s2315_s0 = inlined_call_operand.vmem [shape: bf16[8,34], index: 0, kind: input, shape index: {}]   ;;  %s2316_s1 = inlined_call_operand.hbm [shape: bf16[34,2048], index: 1, kind: input, shape index: {}]   ;;  %s2317_s2 = inlined_call_operand.hbm [shape: bf16[1024,128], index: 2, kind: input, shape index: {}]   ;;  %s2318_s3 = inlined_call_operand.hbm [shape: bf16[128,128], index: 3, kind: input, shape index: {}]   ;;  %s2319_s4 = inlined_call_operand.hbm [shape: bf16[128,128], index: 4, kind: input, shape index: {}]   ;;  %s2320_s5 = inlined_call_operand.vmem [shape: f32[1,1408], index: 5, kind: input, shape index: {}]   ;;  %s2321_s6 = inlined_call_operand.hbm [shape: f32[8,128], index: 6, kind: output, shape index: {0}]   ;;  %s2322_s7 = inlined_call_operand.vmem [shape: f32[8,128], index: 7, kind: output, shape index: {1}]  }
   0x1   :  { %14 = vsyncpa [#allocation6], 0 }
   0x2   :  { %15 = vsyncpa [#allocation9], 0  ;;  %s36_s26 = sshll.u32 %s2317_s2, 4  ;;  %s37_s26 = int_to_ptr.hbm [resolvable:$true] %s36_s26 }
   0x3   :  { %16 = vsyncpa [#allocation4], 0  ;;  %s2168_s27 = smov [#allocation5]   ;;  %s23_s8 = sshll.u32 %s2316_s1, 4  ;;  %s24_s8 = int_to_ptr.hbm [resolvable:$true] %s23_s8 }
   0x4   :  { %s38_s28 = sshll.u32 %s2168_s27, 4  ;;  %s2169_s9 = smov 64   ;;  %s39_s28 = int_to_ptr.vmem [resolvable:$true] %s38_s28 }
   0x5   :  { %s2170_s10 = smov 4   ;;  %s2171_s11 = smov [#allocation2]  }
   0x6   :  { %44 = dma.hbm_to_vmem [thread:$0]  %s37_s26, 8192, %s39_s28, [#allocation6], %s2169_s9, %s2169_s9, %s2170_s10  }
   0x7   :  { %s25_s12 = sshll.u32 %s2171_s11, 4  ;;  %s49_s2 = sshll.u32 %s2318_s3, 4  ;;  %s26_s12 = int_to_ptr.vmem [resolvable:$true] %s25_s12  ;;  %s50_s2 = int_to_ptr.hbm [resolvable:$true] %s49_s2 }
   0x8   :  { %s2172_s15 = smov 1024   ;;  %s2173_s16 = smov [#allocation7]  }
   0x9   :  { %31 = dma.hbm_to_vmem [thread:$0]  %s24_s8, 5120, %s26_s12, [#allocation3], %s2172_s15, %s2172_s15, %s2169_s9  }
   0xa   :  { %s51_s17 = sshll.u32 %s2173_s16, 4  ;;  %s62_s1 = sshll.u32 %s2319_s4, 4  ;;  %s52_s17 = int_to_ptr.vmem [resolvable:$true] %s51_s17  ;;  %s63_s1 = int_to_ptr.hbm [resolvable:$true] %s62_s1 }
   0xb   :  { %57 = dma.hbm_to_vmem [thread:$0]  %s50_s2, 1024, %s52_s17, [#allocation6], %s2169_s9, %s2169_s9, %s2170_s10  }
   0xc   :  { %s2174_s20 = smov [#allocation8]  }
   0xd   :  { %s64_s21 = sshll.u32 %s2174_s20, 4  ;;  %s65_s21 = int_to_ptr.vmem [resolvable:$true] %s64_s21 }
   0xe   :  { %70 = dma.hbm_to_vmem [thread:$0]  %s63_s1, 1024, %s65_s21, [#allocation9], %s2169_s9, %s2169_s9, %s2170_s10  }
   0xf   :  { %2160 = dma.done.wait [#allocation3], 5120  }
  0x10   :  { %2161 = vsyncadd [#allocation3], 4294962176 }
  0x11   :  { %2162 = dma.done.wait [#allocation6], 9216  }
  0x12   :  { %2163 = vsyncadd [#allocation6], 4294958080 }
  0x13   :  { %2164 = dma.done.wait [#allocation9], 1024  }
  0x14   :  { %2165 = vsyncadd [#allocation9], 4294966272  ;;  %v123_v0 = vld [vmem:[#allocation2 + $0x100] sm:$0x11]  ;;  %v125_v1 = vld [vmem:[#allocation2 + $0x110] sm:$0x11] }
  0x15   :  { %v235_v2 = vunpack.c.l.b16 %v123_v0  ;;  %v236_v3 = vunpack.c.h.b16 %v123_v0  ;;  %v239_v4 = vunpack.c.l.b16 %v125_v1  ;;  %v240_v5 = vunpack.c.h.b16 %v125_v1  ;;  %v1519_v6 = vld [vmem:[#allocation2 + $0x80] sm:$0xf]  ;;  %v1933_v12 = vld [vmem:[#allocation2 + $0x84] sm:$0xf]  ;;  %v1535_v14 = vld [vmem:[#allocation2 + $0x90] sm:$0xf] }
  0x16   :  { %vm335_vm0 = vcmask 1040384   ;;  %v1941_v7 = vld [vmem:[#allocation2 + $0xbc] sm:$0xf0]  ;;  %v1521_v13 = vld [vmem:[#allocation2 + $0xc0] sm:$0xf0]  ;;  %vm331_vm1 = vcmask 277504  }
  0x17   :  { %v283_v8 = vpack.c.b16 %v235_v2, %v235_v2  ;;  %v284_v9 = vpack.c.b16 %v236_v3, %v236_v3  ;;  %v287_v10 = vpack.c.b16 %v239_v4, %v239_v4  ;;  %v288_v11 = vpack.c.b16 %v240_v5, %v240_v5  ;;  %v1943_v15 = vld [vmem:[#allocation2 + $0xcc] sm:$0xf0]  ;;  %v1935_v16 = vld [vmem:[#allocation2 + $0x94] sm:$0xf]  ;;  %v1455_v22 = vld [vmem:[#allocation2] sm:$0xf] }
  0x18   :  { %v1537_v17 = vld [vmem:[#allocation2 + $0xd0] sm:$0xf0]  ;;  %v1520_v23 = vor.u32 %v1941_v7, %v1519_v6  ;;  %v1524_v24 = vor.u32 %v1933_v12, %v1521_v13  ;;  %v1925_v25 = vld [vmem:[#allocation2 + $0x3c] sm:$0xf0]  ;;  %v1917_v26 = vld [vmem:[#allocation2 + $0x4] sm:$0xf]  ;;  %v1536_v28 = vor.u32 %v1943_v15, %v1535_v14 }
  0x19   :  { %v337_v18 = vsel %vm335_vm0, %v283_v8, 0  ;;  %v340_v19 = vsel %vm335_vm0, %v284_v9, 0  ;;  %v349_v20 = vsel %vm335_vm0, %v287_v10, 0  ;;  %v352_v21 = vsel %vm335_vm0, %v288_v11, 0  ;;  %v1457_v27 = vld [vmem:[#allocation2 + $0x40] sm:$0xf0] }
  0x1a   :  { %389 = vmatpush.bf16.msra.mxu2 %v337_v18  ;;  %402 = vmatpush.bf16.msra.mxu3 %v340_v19  ;;  %v1540_v29 = vor.u32 %v1935_v16, %v1537_v17  ;;  %v1471_v30 = vld [vmem:[#allocation2 + $0x10] sm:$0xf]  ;;  %v124_v31 = vld [vmem:[#allocation2 + $0x108] sm:$0x11]  ;;  %v127_v32 = vld [vmem:[#allocation2 + $0x120] sm:$0x11]  ;;  %v1456_v40 = vor.u32 %v1925_v25, %v1455_v22  ;;  %v1460_v41 = vor.u32 %v1917_v26, %v1457_v27 }
  0x1b   :  { %441 = vmatpush.bf16.msra.mxu0 %v349_v20  ;;  %454 = vmatpush.bf16.msra.mxu1 %v352_v21  ;;  %v1927_v33 = vld [vmem:[#allocation2 + $0x4c] sm:$0xf0]  ;;  %v1919_v34 = vld [vmem:[#allocation2 + $0x14] sm:$0xf]  ;;  %v237_v36 = vunpack.c.l.b16 %v124_v31  ;;  %v238_v37 = vunpack.c.h.b16 %v124_v31  ;;  %v243_v38 = vunpack.c.l.b16 %v127_v32  ;;  %v244_v39 = vunpack.c.h.b16 %v127_v32  ;;  %v1527_v48 = vld [vmem:[#allocation2 + $0x88] sm:$0xf] }
  0x1c   :  { %v1473_v35 = vld [vmem:[#allocation2 + $0x50] sm:$0xf0]  ;;  %v1472_v44 = vor.u32 %v1927_v33, %v1471_v30  ;;  %v1942_v49 = vld [vmem:[#allocation2 + $0xc4] sm:$0xf0]  ;;  %v1934_v52 = vld [vmem:[#allocation2 + $0x8c] sm:$0xf] }
  0x1d   :  { %v285_v42 = vpack.c.b16 %v237_v36, %v237_v36  ;;  %v286_v43 = vpack.c.b16 %v238_v37, %v238_v37  ;;  %v1476_v45 = vor.u32 %v1919_v34, %v1473_v35  ;;  %v291_v46 = vpack.c.b16 %v243_v38, %v243_v38  ;;  %v1529_v53 = vld [vmem:[#allocation2 + $0xc8] sm:$0xf0]  ;;  %v2237_v54 = vld [vmem:[%s2315_s0] sm:$0xf]  ;;  %v126_v55 = vld [vmem:[#allocation2 + $0x118] sm:$0x11] }
  0x1e   :  { %390 = vmatpush.bf16.msra.mxu2 %v1520_v23  ;;  %403 = vmatpush.bf16.msra.mxu3 %v1524_v24  ;;  %v292_v47 = vpack.c.b16 %v244_v39, %v244_v39  ;;  %v129_v56 = vld [vmem:[#allocation2 + $0x130] sm:$0x11]  ;;  %v1551_v57 = vld [vmem:[#allocation2 + $0xa0] sm:$0xf]  ;;  %v1937_v59 = vld [vmem:[#allocation2 + $0xa4] sm:$0xf]  ;;  %v241_v60 = vunpack.c.l.b16 %v126_v55  ;;  %v242_v61 = vunpack.c.h.b16 %v126_v55  ;;  %v1528_v0 = vor.u32 %v1942_v49, %v1527_v48 }
  0x1f   :  { %442 = vmatpush.bf16.msra.mxu0 %v1536_v28  ;;  %455 = vmatpush.bf16.msra.mxu1 %v1540_v29  ;;  %v343_v50 = vsel %vm335_vm0, %v285_v42, 0  ;;  %v346_v51 = vsel %vm335_vm0, %v286_v43, 0  ;;  %v1945_v58 = vld [vmem:[#allocation2 + $0xdc] sm:$0xf0]  ;;  %v361_v62 = vsel %vm335_vm0, %v291_v46, 0  ;;  %v1532_v1 = vor.u32 %v1934_v52, %v1529_v53  ;;  %s2175_s27 = smov [#allocation10]  }
  0x20   :  { %v364_v63 = vsel %vm335_vm0, %v292_v47, 0  ;;  %v1553_v2 = vld [vmem:[#allocation2 + $0xe0] sm:$0xf0]  ;;  %v1463_v3 = vld [vmem:[#allocation2 + $0x8] sm:$0xf]  ;;  %v247_v7 = vunpack.c.l.b16 %v129_v56  ;;  %v248_v8 = vunpack.c.h.b16 %v129_v56  ;;  %v289_v9 = vpack.c.b16 %v241_v60, %v241_v60  ;;  %s1435_s28 = sshll.u32 %s2175_s27, 4  ;;  %s1436_s28 = int_to_ptr.vmem [resolvable:$true] %s1435_s28 }
  0x21   :  { %v1926_v4 = vld [vmem:[#allocation2 + $0x44] sm:$0xf0]  ;;  %v1918_v5 = vld [vmem:[#allocation2 + $0xc] sm:$0xf]  ;;  %v290_v10 = vpack.c.b16 %v242_v61, %v242_v61  ;;  %v1552_v11 = vor.u32 %v1945_v58, %v1551_v57  ;;  %v1556_v12 = vor.u32 %v1937_v59, %v1553_v2  ;;  %v1487_v13 = vld [vmem:[#allocation2 + $0x20] sm:$0xf] }
  0x22   :  { %391 = vmatpush.bf16.msra.mxu2 %v1456_v40  ;;  %404 = vmatpush.bf16.msra.mxu3 %v1460_v41  ;;  %v1465_v6 = vld [vmem:[#allocation2 + $0x48] sm:$0xf0]  ;;  %v1464_v14 = vor.u32 %v1926_v4, %v1463_v3  ;;  %v1929_v16 = vld [vmem:[#allocation2 + $0x5c] sm:$0xf0]  ;;  %v1921_v17 = vld [vmem:[#allocation2 + $0x24] sm:$0xf]  ;;  %v295_v19 = vpack.c.b16 %v247_v7, %v247_v7  ;;  %v296_v22 = vpack.c.b16 %v248_v8, %v248_v8 }
  0x23   :  { %443 = vmatpush.bf16.msra.mxu0 %v1472_v44  ;;  %456 = vmatpush.bf16.msra.mxu1 %v1476_v45  ;;  %v1468_v15 = vor.u32 %v1918_v5, %v1465_v6  ;;  %v1489_v18 = vld [vmem:[#allocation2 + $0x60] sm:$0xf0]  ;;  %v1543_v20 = vld [vmem:[#allocation2 + $0x98] sm:$0xf]  ;;  %v355_v23 = vsel %vm335_vm0, %v289_v9, 0  ;;  %v358_v24 = vsel %vm335_vm0, %v290_v10, 0  ;;  %v1488_v27 = vor.u32 %v1929_v16, %v1487_v13 }
  0x24   :  { %v1944_v21 = vld [vmem:[#allocation2 + $0xd4] sm:$0xf0]  ;;  %v1936_v25 = vld [vmem:[#allocation2 + $0x9c] sm:$0xf]  ;;  %v1492_v28 = vor.u32 %v1921_v17, %v1489_v18  ;;  %v1567_v29 = vld [vmem:[#allocation2 + $0xb0] sm:$0xf] }
  0x25   :  { %1581 = vmatmul.msk.bf16.vlgmr.msra.gmra.mxu2 %vm331_vm1, %v2237_v54  ;;  %1582 = vmatmul.msk.bf16.vlgmr.msra.gmra.mxu3 %vm331_vm1, %v2237_v54  ;;  %v1545_v26 = vld [vmem:[#allocation2 + $0xd8] sm:$0xf0]  ;;  %v1947_v30 = vld [vmem:[#allocation2 + $0xec] sm:$0xf0]  ;;  %v128_v31 = vld [vmem:[#allocation2 + $0x128] sm:$0x11]  ;;  %v1544_v33 = vor.u32 %v1944_v21, %v1543_v20 }
  0x26   :  { %415 = vmatpush.bf16.msrb.mxu2 %v343_v50  ;;  %428 = vmatpush.bf16.msrb.mxu3 %v346_v51  ;;  %v373_v32 = vsel %vm335_vm0, %v295_v19, 0  ;;  %v376_v34 = vsel %vm335_vm0, %v296_v22, 0  ;;  %v1548_v35 = vor.u32 %v1936_v25, %v1545_v26  ;;  %v1939_v36 = vld [vmem:[#allocation2 + $0xb4] sm:$0xf]  ;;  %v245_v38 = vunpack.c.l.b16 %v128_v31  ;;  %v1479_v40 = vld [vmem:[#allocation2 + $0x18] sm:$0xf] }
  0x27   :  { %1585 = vmatmul.msk.bf16.vlgmr.msra.gmra.mxu0 %vm331_vm1, %v2237_v54  ;;  %1586 = vmatmul.msk.bf16.vlgmr.msra.gmra.mxu1 %vm331_vm1, %v2237_v54  ;;  %v1569_v37 = vld [vmem:[#allocation2 + $0xf0] sm:$0xf0]  ;;  %v246_v39 = vunpack.c.h.b16 %v128_v31  ;;  %v1928_v41 = vld [vmem:[#allocation2 + $0x54] sm:$0xf0]  ;;  %v1568_v42 = vor.u32 %v1947_v30, %v1567_v29  ;;  %v1920_v44 = vld [vmem:[#allocation2 + $0x1c] sm:$0xf] }
  0x28   :  { %493 = vmatpush.bf16.msrb.mxu0 %v361_v62  ;;  %506 = vmatpush.bf16.msrb.mxu1 %v364_v63  ;;  %v1572_v43 = vor.u32 %v1939_v36, %v1569_v37  ;;  %v1481_v45 = vld [vmem:[#allocation2 + $0x58] sm:$0xf0]  ;;  %v1503_v46 = vld [vmem:[#allocation2 + $0x30] sm:$0xf]  ;;  %v1923_v48 = vld [vmem:[#allocation2 + $0x34] sm:$0xf]  ;;  %v293_v50 = vpack.c.b16 %v245_v38, %v245_v38  ;;  %v1480_v52 = vor.u32 %v1928_v41, %v1479_v40 }
  0x29   :  { %v1931_v47 = vld [vmem:[#allocation2 + $0x6c] sm:$0xf0]  ;;  %v1505_v49 = vld [vmem:[#allocation2 + $0x70] sm:$0xf0]  ;;  %v294_v51 = vpack.c.b16 %v246_v39, %v246_v39  ;;  %v1484_v53 = vor.u32 %v1920_v44, %v1481_v45  ;;  %v1559_v57 = vld [vmem:[#allocation2 + $0xa8] sm:$0xf] }
  0x2a   :  { %416 = vmatpush.bf16.msrb.mxu2 %v1528_v0  ;;  %429 = vmatpush.bf16.msrb.mxu3 %v1532_v1  ;;  %v1504_v55 = vor.u32 %v1931_v47, %v1503_v46  ;;  %v1508_v56 = vor.u32 %v1923_v48, %v1505_v49  ;;  %v1946_v58 = vld [vmem:[#allocation2 + $0xe4] sm:$0xf0]  ;;  %v367_v59 = vsel %vm335_vm0, %v293_v50, 0  ;;  %v1938_v61 = vld [vmem:[#allocation2 + $0xac] sm:$0xf]  ;;  %v1956_v18 = vld [vmem:[#allocation5 + $0x38] sm:$0xff] }
  0x2b   :  { %v370_v60 = vsel %vm335_vm0, %v294_v51, 0  ;;  %v1561_v62 = vld [vmem:[#allocation2 + $0xe8] sm:$0xf0]  ;;  %v1560_v63 = vor.u32 %v1946_v58, %v1559_v57  ;;  %v1495_v1 = vld [vmem:[#allocation2 + $0x28] sm:$0xf]  ;;  %v1964_v19 = vld [vmem:[#allocation5 + $0x78] sm:$0xff] }
  0x2c   :  { %494 = vmatpush.bf16.msrb.mxu0 %v1552_v11  ;;  %507 = vmatpush.bf16.msrb.mxu1 %v1556_v12  ;;  %v1564_v0 = vor.u32 %v1938_v61, %v1561_v62  ;;  %v130_v2 = vld [vmem:[#allocation2 + $0x138] sm:$0x11]  ;;  %v1930_v3 = vld [vmem:[#allocation2 + $0x64] sm:$0xf0]  ;;  %v1922_v4 = vld [vmem:[#allocation2 + $0x2c] sm:$0xf] }
  0x2d   :  { %v1497_v5 = vld [vmem:[#allocation2 + $0x68] sm:$0xf0]  ;;  %v249_v6 = vunpack.c.l.b16 %v130_v2  ;;  %v250_v7 = vunpack.c.h.b16 %v130_v2  ;;  %v1496_v8 = vor.u32 %v1930_v3, %v1495_v1  ;;  %v1575_v12 = vld [vmem:[#allocation2 + $0xb8] sm:$0xf]  ;;  %v1940_v16 = vld [vmem:[#allocation2 + $0xbc] sm:$0xf] }
  0x2e   :  { %417 = vmatpush.bf16.msrb.mxu2 %v1464_v14  ;;  %430 = vmatpush.bf16.msrb.mxu3 %v1468_v15  ;;  %v1500_v9 = vor.u32 %v1922_v4, %v1497_v5  ;;  %v1948_v13 = vld [vmem:[#allocation2 + $0xf4] sm:$0xf0]  ;;  %v1577_v17 = vld [vmem:[#allocation2 + $0xf8] sm:$0xf0]  ;;  %v1955_v26 = vld [vmem:[#allocation5 + $0x30] sm:$0xff]  ;;  %s1437_s8 = sshll.u32 %s2321_s6, 4  ;;  %s1438_s8 = int_to_ptr.hbm [resolvable:$true] %s1437_s8 }
  0x2f   :  { %v297_v10 = vpack.c.b16 %v249_v6, %v249_v6  ;;  %v298_v11 = vpack.c.b16 %v250_v7, %v250_v7  ;;  %v1576_v20 = vor.u32 %v1948_v13, %v1575_v12  ;;  %v1580_v21 = vor.u32 %v1940_v16, %v1577_v17  ;;  %v1511_v22 = vld [vmem:[#allocation2 + $0x38] sm:$0xf]  ;;  %v1513_v25 = vld [vmem:[#allocation2 + $0x78] sm:$0xf0]  ;;  %v1954_v30 = vld [vmem:[#allocation5 + $0x28] sm:$0xff] }
  0x30   :  { %495 = vmatpush.bf16.msrb.mxu0 %v1488_v27  ;;  %508 = vmatpush.bf16.msrb.mxu1 %v1492_v28  ;;  %v1963_v27 = vld [vmem:[#allocation5 + $0x70] sm:$0xff]  ;;  %v1962_v31 = vld [vmem:[#allocation5 + $0x68] sm:$0xff]  ;;  %v1949_v40 = vld [vmem:[#allocation5] sm:$0xff] }
  0x31   :  { %v379_v14 = vsel %vm335_vm0, %v297_v10, 0  ;;  %v382_v15 = vsel %vm335_vm0, %v298_v11, 0  ;;  %v1951_v36 = vld [vmem:[#allocation5 + $0x10] sm:$0xff]  ;;  %v1950_v38 = vld [vmem:[#allocation5 + $0x8] sm:$0xff]  ;;  %v1988_v41 = vld [vmem:[#allocation5 + $0x138] sm:$0xff] }
  0x32   :  { %467 = vmatpush.bf16.msra.mxu2 %v355_v23  ;;  %480 = vmatpush.bf16.msra.mxu3 %v358_v24  ;;  %v1932_v23 = vld [vmem:[#allocation2 + $0x74] sm:$0xf0]  ;;  %v1924_v24 = vld [vmem:[#allocation2 + $0x3c] sm:$0xf]  ;;  %v1959_v37 = vld [vmem:[#allocation5 + $0x50] sm:$0xff] }
  0x33   :  { %v1512_v28 = vor.u32 %v1932_v23, %v1511_v22  ;;  %v1516_v29 = vor.u32 %v1924_v24, %v1513_v25  ;;  %v1958_v39 = vld [vmem:[#allocation5 + $0x48] sm:$0xff]  ;;  %v1987_v44 = vld [vmem:[#allocation5 + $0x130] sm:$0xff]  ;;  %v1972_v46 = vld [vmem:[#allocation5 + $0xb8] sm:$0xff] }
  0x34   :  { %545 = vmatpush.bf16.msra.mxu0 %v373_v32  ;;  %558 = vmatpush.bf16.msra.mxu1 %v376_v34  ;;  %v1953_v32 = vld [vmem:[#allocation5 + $0x20] sm:$0xff]  ;;  %v1952_v34 = vld [vmem:[#allocation5 + $0x18] sm:$0xff]  ;;  %v1995_v45 = vld [vmem:[#allocation5 + $0x170] sm:$0xff] }
  0x35   :  { %1583 = vmatmul.msk.bf16.vlgmr.msrb.gmra.mxu2 %vm331_vm1, %v2237_v54  ;;  %1584 = vmatmul.msk.bf16.vlgmr.msrb.gmra.mxu3 %vm331_vm1, %v2237_v54  ;;  %v1980_v47 = vld [vmem:[#allocation5 + $0xf8] sm:$0xff]  ;;  %v1994_v48 = vld [vmem:[#allocation5 + $0x168] sm:$0xff]  ;;  %v1985_v49 = vld [vmem:[#allocation5 + $0x120] sm:$0xff] }
  0x36   :  { %468 = vmatpush.bf16.msra.mxu2 %v1544_v33  ;;  %481 = vmatpush.bf16.msra.mxu3 %v1548_v35  ;;  %v1961_v33 = vld [vmem:[#allocation5 + $0x60] sm:$0xff]  ;;  %v1960_v35 = vld [vmem:[#allocation5 + $0x58] sm:$0xff]  ;;  %v1971_v50 = vld [vmem:[#allocation5 + $0xb0] sm:$0xff] }
  0x37   :  { %1589 = vmatmul.msk.bf16.vlgmr.msrb.gmra.mxu0 %vm331_vm1, %v2237_v54  ;;  %1590 = vmatmul.msk.bf16.vlgmr.msrb.gmra.mxu1 %vm331_vm1, %v2237_v54  ;;  %v1979_v51 = vld [vmem:[#allocation5 + $0xf0] sm:$0xff]  ;;  %v1992_v57 = vld [vmem:[#allocation5 + $0x158] sm:$0xff]  ;;  %v1990_v3 = vld [vmem:[#allocation5 + $0x148] sm:$0xff] }
  0x38   :  { %546 = vmatpush.bf16.msra.mxu0 %v1568_v42  ;;  %559 = vmatpush.bf16.msra.mxu1 %v1572_v43  ;;  %v1957_v42 = vld [vmem:[#allocation5 + $0x40] sm:$0xff]  ;;  %v1996_v43 = vld [vmem:[#allocation5 + $0x178] sm:$0xff]  ;;  %v1983_v58 = vld [vmem:[#allocation5 + $0x110] sm:$0xff] }
  0x39   :  { %v1991_v61 = vld [vmem:[#allocation5 + $0x150] sm:$0xff]  ;;  %v1968_v1 = vld [vmem:[#allocation5 + $0x98] sm:$0xff]  ;;  %v1981_v4 = vld [vmem:[#allocation5 + $0x100] sm:$0xff] }
  0x3a   :  { %469 = vmatpush.bf16.msra.mxu2 %v1480_v52  ;;  %482 = vmatpush.bf16.msra.mxu3 %v1484_v53  ;;  %v1993_v52 = vld [vmem:[#allocation5 + $0x160] sm:$0xff]  ;;  %v1984_v53 = vld [vmem:[#allocation5 + $0x118] sm:$0xff]  ;;  %v1967_v7 = vld [vmem:[#allocation5 + $0x90] sm:$0xff] }
  0x3b   :  { %v1976_v2 = vld [vmem:[#allocation5 + $0xd8] sm:$0xff]  ;;  %v1966_v12 = vld [vmem:[#allocation5 + $0x88] sm:$0xff]  ;;  %v1965_v17 = vld [vmem:[#allocation5 + $0x80] sm:$0xff] }
  0x3c   :  { %547 = vmatpush.bf16.msra.mxu0 %v1504_v55  ;;  %560 = vmatpush.bf16.msra.mxu1 %v1508_v56  ;;  %v1970_v55 = vld [vmem:[#allocation5 + $0xa8] sm:$0xff]  ;;  %v2003_v25 = vld [vmem:[#allocation5 + $0x1b0] sm:$0xff] }
  0x3d   :  { %v1978_v56 = vld [vmem:[#allocation5 + $0xe8] sm:$0xff] }
  0x3e   :  { %519 = vmatpush.bf16.msrb.mxu2 %v367_v59  ;;  %532 = vmatpush.bf16.msrb.mxu3 %v370_v60  ;;  %v1969_v59 = vld [vmem:[#allocation5 + $0xa0] sm:$0xff]  ;;  %v1974_v13 = vld [vmem:[#allocation5 + $0xc8] sm:$0xff] }
  0x3f   :  { %v1977_v60 = vld [vmem:[#allocation5 + $0xe0] sm:$0xff] }
  0x40   :  { %1158 = vmatpush.bf16.msrb.mxu0 %v1956_v18  ;;  %1171 = vmatpush.bf16.msrb.mxu1 %v1964_v19  ;;  %v1973_v18 = vld [vmem:[#allocation5 + $0xc0] sm:$0xff]  ;;  %v2004_v19 = vld [vmem:[#allocation5 + $0x1b8] sm:$0xff] }
  0x42   :  { %520 = vmatpush.bf16.msrb.mxu2 %v1560_v63  ;;  %533 = vmatpush.bf16.msrb.mxu3 %v1564_v0  ;;  %v1982_v0 = vld [vmem:[#allocation5 + $0x108] sm:$0xff] }
  0x44   :  { %1159 = vmatpush.bf16.msrb.mxu0 %v1955_v26  ;;  %1172 = vmatpush.bf16.msrb.mxu1 %v1963_v27  ;;  %v2011_v26 = vld [vmem:[#allocation5 + $0x1f0] sm:$0xff] }
  0x45   :  { %1587 = vmatmul.msk.bf16.vlgmr.msra.gmra.mxu2 %vm331_vm1, %v2237_v54  ;;  %1588 = vmatmul.msk.bf16.vlgmr.msra.gmra.mxu3 %vm331_vm1, %v2237_v54 }
  0x46   :  { %521 = vmatpush.bf16.msrb.mxu2 %v1496_v8  ;;  %534 = vmatpush.bf16.msrb.mxu3 %v1500_v9  ;;  %v1975_v8 = vld [vmem:[#allocation5 + $0xd0] sm:$0xff]  ;;  %v1989_v9 = vld [vmem:[#allocation5 + $0x140] sm:$0xff] }
  0x47   :  { %1593 = vmatmul.msk.bf16.vlgmr.msra.gmra.mxu0 %vm331_vm1, %v2237_v54  ;;  %1594 = vmatmul.msk.bf16.vlgmr.msra.gmra.mxu1 %vm331_vm1, %v2237_v54 }
  0x48   :  { %1160 = vmatpush.bf16.msrb.mxu0 %v1954_v30  ;;  %1173 = vmatpush.bf16.msrb.mxu1 %v1962_v31 }
  0x4a   :  { %571 = vmatpush.bf16.msra.mxu2 %v379_v14  ;;  %584 = vmatpush.bf16.msra.mxu3 %v382_v15  ;;  %v2288_v14 = vld [vmem:[%s2320_s5] sm:$0xff] }
  0x4b   :  { %v603_v22 = vperm.slane %v2288_v14, 1 }
  0x4c   :  { %1161 = vmatpush.bf16.msrb.mxu0 %v1953_v32  ;;  %1174 = vmatpush.bf16.msrb.mxu1 %v1961_v33 }
  0x4e   :  { %572 = vmatpush.bf16.msra.mxu2 %v1576_v20  ;;  %585 = vmatpush.bf16.msra.mxu3 %v1580_v21  ;;  %v2012_v20 = vld [vmem:[#allocation5 + $0x1f8] sm:$0xff]  ;;  %v602_v21 = vperm.slane %v2288_v14, 0 }
  0x50   :  { %1162 = vmatpush.bf16.msrb.mxu0 %v1952_v34  ;;  %1175 = vmatpush.bf16.msrb.mxu1 %v1960_v35  ;;  %v2002_v35 = vld [vmem:[#allocation5 + $0x1a8] sm:$0xff] }
  0x52   :  { %573 = vmatpush.bf16.msra.mxu2 %v1512_v28  ;;  %586 = vmatpush.bf16.msra.mxu3 %v1516_v29 }
  0x54   :  { %1163 = vmatpush.bf16.msrb.mxu0 %v1951_v36  ;;  %1176 = vmatpush.bf16.msrb.mxu1 %v1959_v37  ;;  %v2010_v36 = vld [vmem:[#allocation5 + $0x1e8] sm:$0xff] }
  0x55   :  { %1591 = vmatmul.msk.bf16.vlgmr.msrb.gmra.mxu2 %vm331_vm1, %v2237_v54  ;;  %1592 = vmatmul.msk.bf16.vlgmr.msrb.gmra.mxu3 %vm331_vm1, %v2237_v54 }
  0x56   :  { %1184 = vmatpush.bf16.msrb.mxu2 %v1972_v46  ;;  %1197 = vmatpush.bf16.msrb.mxu3 %v1980_v47  ;;  %v606_v46 = vperm.slane %v2288_v14, 4  ;;  %v607_v47 = vperm.slane %v2288_v14, 5 }
  0x58   :  { %1164 = vmatpush.bf16.msrb.mxu0 %v1950_v38  ;;  %1177 = vmatpush.bf16.msrb.mxu1 %v1958_v39 }
  0x5a   :  { %1185 = vmatpush.bf16.msrb.mxu2 %v1971_v50  ;;  %1198 = vmatpush.bf16.msrb.mxu3 %v1979_v51  ;;  %v1999_v50 = vld [vmem:[#allocation5 + $0x190] sm:$0xff] }
  0x5b   :  { %v2007_v51 = vld [vmem:[#allocation5 + $0x1d0] sm:$0xff] }
  0x5c   :  { %1165 = vmatpush.bf16.msrb.mxu0 %v1949_v40  ;;  %1178 = vmatpush.bf16.msrb.mxu1 %v1957_v42  ;;  %v2009_v42 = vld [vmem:[#allocation5 + $0x1e0] sm:$0xff] }
  0x5e   :  { %1186 = vmatpush.bf16.msrb.mxu2 %v1970_v55  ;;  %1199 = vmatpush.bf16.msrb.mxu3 %v1978_v56 }
  0x60   :  { %1210 = vmatpush.bf16.msra.mxu0 %v1988_v41  ;;  %1223 = vmatpush.bf16.msra.mxu1 %v1996_v43  ;;  %v2001_v41 = vld [vmem:[#allocation5 + $0x1a0] sm:$0xff] }
  0x62   :  { %1187 = vmatpush.bf16.msrb.mxu2 %v1969_v59  ;;  %1200 = vmatpush.bf16.msrb.mxu3 %v1977_v60 }
  0x64   :  { %1211 = vmatpush.bf16.msra.mxu0 %v1987_v44  ;;  %1224 = vmatpush.bf16.msra.mxu1 %v1995_v45  ;;  %v2000_v45 = vld [vmem:[#allocation5 + $0x198] sm:$0xff] }
  0x65   :  { %1595 = vmatmul.msk.bf16.vlgmr.msra.gmra.mxu2 %vm331_vm1, %v2237_v54  ;;  %1596 = vmatmul.msk.bf16.vlgmr.msra.gmra.mxu3 %vm331_vm1, %v2237_v54  ;;  %v1986_v54 = vld [vmem:[#allocation5 + $0x128] sm:$0xff] }
  0x66   :  { %1188 = vmatpush.bf16.msrb.mxu2 %v1968_v1  ;;  %1201 = vmatpush.bf16.msrb.mxu3 %v1976_v2 }
  0x68   :  { %1212 = vmatpush.bf16.msra.mxu0 %v1986_v54  ;;  %1225 = vmatpush.bf16.msra.mxu1 %v1994_v48  ;;  %v2008_v54 = vld [vmem:[#allocation5 + $0x1d8] sm:$0xff] }
  0x6a   :  { %1189 = vmatpush.bf16.msrb.mxu2 %v1967_v7  ;;  %1202 = vmatpush.bf16.msrb.mxu3 %v1975_v8  ;;  %v604_v7 = vperm.slane %v2288_v14, 2  ;;  %v605_v8 = vperm.slane %v2288_v14, 3 }
  0x6c   :  { %1213 = vmatpush.bf16.msra.mxu0 %v1985_v49  ;;  %1226 = vmatpush.bf16.msra.mxu1 %v1993_v52 }
  0x6e   :  { %1190 = vmatpush.bf16.msrb.mxu2 %v1966_v12  ;;  %1203 = vmatpush.bf16.msrb.mxu3 %v1974_v13 }
  0x70   :  { %1214 = vmatpush.bf16.msra.mxu0 %v1984_v53  ;;  %1227 = vmatpush.bf16.msra.mxu1 %v1992_v57 }
  0x72   :  { %1191 = vmatpush.bf16.msrb.mxu2 %v1965_v17  ;;  %1204 = vmatpush.bf16.msrb.mxu3 %v1973_v18 }
  0x74   :  { %1215 = vmatpush.bf16.msra.mxu0 %v1983_v58  ;;  %1228 = vmatpush.bf16.msra.mxu1 %v1991_v61  ;;  %v1998_v61 = vld [vmem:[#allocation5 + $0x188] sm:$0xff] }
  0x76   :  { %1236 = vmatpush.bf16.msra.mxu2 %v2004_v19  ;;  %1249 = vmatpush.bf16.msra.mxu3 %v2012_v20 }
  0x78   :  { %1216 = vmatpush.bf16.msra.mxu0 %v1982_v0  ;;  %1229 = vmatpush.bf16.msra.mxu1 %v1990_v3  ;;  %v2006_v0 = vld [vmem:[#allocation5 + $0x1c8] sm:$0xff] }
  0x7a   :  { %1237 = vmatpush.bf16.msra.mxu2 %v2003_v25  ;;  %1250 = vmatpush.bf16.msra.mxu3 %v2011_v26 }
  0x7c   :  { %1217 = vmatpush.bf16.msra.mxu0 %v1981_v4  ;;  %1230 = vmatpush.bf16.msra.mxu1 %v1989_v9 }
  0x7e   :  { %1238 = vmatpush.bf16.msra.mxu2 %v2002_v35  ;;  %1251 = vmatpush.bf16.msra.mxu3 %v2010_v36  ;;  %v2020_v36 = vld [vmem:[#allocation7 + $0x38] sm:$0xff] }
  0x82   :  { %1239 = vmatpush.bf16.msra.mxu2 %v2001_v41  ;;  %1252 = vmatpush.bf16.msra.mxu3 %v2009_v42  ;;  %v2018_v41 = vld [vmem:[#allocation7 + $0x28] sm:$0xff] }
  0x86   :  { %1240 = vmatpush.bf16.msra.mxu2 %v2000_v45  ;;  %1253 = vmatpush.bf16.msra.mxu3 %v2008_v54  ;;  %v2016_v45 = vld [vmem:[#allocation7 + $0x18] sm:$0xff]  ;;  %v2015_v54 = vld [vmem:[#allocation7 + $0x10] sm:$0xff] }
  0x8a   :  { %1241 = vmatpush.bf16.msra.mxu2 %v1999_v50  ;;  %1254 = vmatpush.bf16.msra.mxu3 %v2007_v51  ;;  %v2037_v50 = vld [vmem:[%s2320_s5 + $0x8] ss:$0 sm:$0xff]  ;;  %v2028_v51 = vld [vmem:[#allocation8 + $0x38] sm:$0xff] }
  0x8e   :  { %1242 = vmatpush.bf16.msra.mxu2 %v1998_v61  ;;  %1255 = vmatpush.bf16.msra.mxu3 %v2006_v0  ;;  %v2024_v0 = vld [vmem:[#allocation8 + $0x18] sm:$0xff] }
  0xa4   :  { %v2281_v62 = vpop.f32.mrf.mxu0  ;;  %v2283_v63 = vpop.f32.mrf.mxu1 }
  0xa8   :  { %v393_v5 = vpop.f32.mrf.mxu2  ;;  %v406_v6 = vpop.f32.mrf.mxu3 }
  0xac   :  { %v447_v10 = vpop.f32.mrf.mxu0  ;;  %v460_v11 = vpop.f32.mrf.mxu1 }
  0xb0   :  { %v395_v15 = vpop.f32.mrf.mxu2  ;;  %v408_v16 = vpop.f32.mrf.mxu3 }
  0xb4   :  { %v497_v23 = vpop.f32.mrf.mxu0  ;;  %v510_v24 = vpop.f32.mrf.mxu1 }
  0xb5   :  { %v593_v27 = vmax.f32 %v393_v5, %v497_v23  ;;  %v594_v28 = vmax.f32 %v406_v6, %v510_v24  ;;  %v609_v23 = vperm.slane %v2288_v14, 7 }
  0xb7   :  { %v618_v29 = vadd.f32 %v602_v21, %v593_v27  ;;  %v619_v30 = vadd.f32 %v603_v22, %v594_v28  ;;  %v608_v22 = vperm.slane %v2288_v14, 6 }
  0xb8   :  { %v419_v33 = vpop.f32.mrf.mxu2  ;;  %v432_v34 = vpop.f32.mrf.mxu3 }
  0xb9   :  { %v626_v31 = vmax.f32 %v618_v29, 0.0  ;;  %v627_v32 = vmax.f32 %v619_v30, 0.0 }
  0xbb   :  { %v635_v37 = vpack.c.bf16 %v626_v31, %v626_v31  ;;  %v636_v38 = vpack.c.bf16 %v627_v32, %v627_v32 }
  0xbc   :  { %v499_v39 = vpop.f32.mrf.mxu0  ;;  %v512_v40 = vpop.f32.mrf.mxu1 }
  0xbd   :  { %1166 = vmatmul.bf16.vlgmr.msrb.gmra.mxu0 %v635_v37  ;;  %1179 = vmatmul.bf16.vlgmr.msrb.gmra.mxu1 %v636_v38  ;;  %v2019_v37 = vld [vmem:[#allocation7 + $0x30] sm:$0xff] }
  0xbe   :  { %1333 = vmatpush.bf16.msrb.mxu0 %v2020_v36  ;;  %1416 = vmatpush.bf16.msrb.mxu1 %v2028_v51 }
  0xc0   :  { %v421_v43 = vpop.f32.mrf.mxu2  ;;  %v434_v44 = vpop.f32.mrf.mxu3 }
  0xc1   :  { %v2017_v44 = vld [vmem:[#allocation7 + $0x20] sm:$0xff] }
  0xc2   :  { %1334 = vmatpush.bf16.msrb.mxu0 %v2019_v37 }
  0xc4   :  { %v549_v48 = vpop.f32.mrf.mxu0  ;;  %v562_v49 = vpop.f32.mrf.mxu1 }
  0xc5   :  { %v597_v52 = vmax.f32 %v2281_v62, %v549_v48  ;;  %v598_v53 = vmax.f32 %v2283_v63, %v562_v49  ;;  %v1997_v62 = vld [vmem:[#allocation5 + $0x180] sm:$0xff]  ;;  %v2014_v48 = vld [vmem:[#allocation7 + $0x8] sm:$0xff] }
  0xc6   :  { %v2005_v63 = vld [vmem:[#allocation5 + $0x1c0] sm:$0xff]  ;;  %1243 = vmatpush.bf16.msra.mxu2 %v1997_v62  ;;  %1335 = vmatpush.bf16.msrb.mxu0 %v2018_v41 }
  0xc7   :  { %v622_v55 = vadd.f32 %v606_v46, %v597_v52  ;;  %v623_v56 = vadd.f32 %v607_v47, %v598_v53  ;;  %1256 = vmatpush.bf16.msra.mxu3 %v2005_v63  ;;  %v2013_v49 = vld [vmem:[#allocation7] sm:$0xff]  ;;  %v2027_v52 = vld [vmem:[#allocation8 + $0x30] sm:$0xff] }
  0xc8   :  { %v471_v59 = vpop.f32.mrf.mxu2  ;;  %v484_v60 = vpop.f32.mrf.mxu3  ;;  %1417 = vmatpush.bf16.msrb.mxu1 %v2027_v52 }
  0xc9   :  { %v630_v57 = vmax.f32 %v622_v55, 0.0  ;;  %v631_v58 = vmax.f32 %v623_v56, 0.0  ;;  %v2026_v55 = vld [vmem:[#allocation8 + $0x28] sm:$0xff] }
  0xca   :  { %1336 = vmatpush.bf16.msrb.mxu0 %v2017_v44 }
  0xcb   :  { %v639_v1 = vpack.c.bf16 %v630_v57, %v630_v57  ;;  %v640_v2 = vpack.c.bf16 %v631_v58, %v631_v58 }
  0xcc   :  { %v551_v3 = vpop.f32.mrf.mxu0  ;;  %v564_v4 = vpop.f32.mrf.mxu1  ;;  %1418 = vmatpush.bf16.msrb.mxu1 %v2026_v55 }
  0xcd   :  { %1218 = vmatmul.bf16.vlgmr.msra.gmra.mxu0 %v639_v1  ;;  %1231 = vmatmul.bf16.vlgmr.msra.gmra.mxu1 %v640_v2  ;;  %v2023_v4 = vld [vmem:[#allocation8 + $0x10] sm:$0xff] }
  0xce   :  { %1337 = vmatpush.bf16.msrb.mxu0 %v2016_v45 }
  0xd0   :  { %v473_v5 = vpop.f32.mrf.mxu2  ;;  %v486_v6 = vpop.f32.mrf.mxu3 }
  0xd2   :  { %1338 = vmatpush.bf16.msrb.mxu0 %v2015_v54 }
  0xd6   :  { %1339 = vmatpush.bf16.msrb.mxu0 %v2014_v48 }
  0xd8   :  { %v523_v9 = vpop.f32.mrf.mxu2  ;;  %v536_v10 = vpop.f32.mrf.mxu3 }
  0xd9   :  { %v595_v11 = vmax.f32 %v419_v33, %v523_v9  ;;  %v596_v12 = vmax.f32 %v432_v34, %v536_v10 }
  0xda   :  { %1340 = vmatpush.bf16.msrb.mxu0 %v2013_v49 }
  0xdb   :  { %v620_v13 = vadd.f32 %v604_v7, %v595_v11  ;;  %v621_v15 = vadd.f32 %v605_v8, %v596_v12  ;;  %v2022_v12 = vld [vmem:[#allocation8 + $0x8] sm:$0xff] }
  0xdd   :  { %v628_v16 = vmax.f32 %v620_v13, 0.0  ;;  %v629_v17 = vmax.f32 %v621_v15, 0.0  ;;  %v2021_v13 = vld [vmem:[#allocation8] sm:$0xff]  ;;  %v2038_v15 = vld [vmem:[%s2320_s5 + $0x9] ss:$0 sm:$0xff] }
  0xdf   :  { %v637_v18 = vpack.c.bf16 %v628_v16, %v628_v16  ;;  %v638_v19 = vpack.c.bf16 %v629_v17, %v629_v17 }
  0xe0   :  { %v525_v20 = vpop.f32.mrf.mxu2  ;;  %v538_v21 = vpop.f32.mrf.mxu3 }
  0xe1   :  { %1192 = vmatmul.bf16.vlgmr.msrb.gmra.mxu2 %v637_v18  ;;  %1205 = vmatmul.bf16.vlgmr.msrb.gmra.mxu3 %v638_v19  ;;  %v2039_v21 = vld [vmem:[%s2320_s5 + $0xa] ss:$0 sm:$0xff] }
  0xe8   :  { %v575_v24 = vpop.f32.mrf.mxu2  ;;  %v588_v25 = vpop.f32.mrf.mxu3 }
  0xe9   :  { %v599_v26 = vmax.f32 %v471_v59, %v575_v24  ;;  %v600_v27 = vmax.f32 %v484_v60, %v588_v25  ;;  %v2025_v60 = vld [vmem:[#allocation8 + $0x20] sm:$0xff] }
  0xea   :  { %1419 = vmatpush.bf16.msrb.mxu1 %v2025_v60 }
  0xeb   :  { %v624_v28 = vadd.f32 %v608_v22, %v599_v26  ;;  %v625_v29 = vadd.f32 %v609_v23, %v600_v27 }
  0xed   :  { %v632_v30 = vmax.f32 %v624_v28, 0.0  ;;  %v633_v31 = vmax.f32 %v625_v29, 0.0 }
  0xee   :  { %1420 = vmatpush.bf16.msrb.mxu1 %v2024_v0 }
  0xef   :  { %v641_v32 = vpack.c.bf16 %v632_v30, %v632_v30  ;;  %v642_v33 = vpack.c.bf16 %v633_v31, %v633_v31 }
  0xf0   :  { %v577_v34 = vpop.f32.mrf.mxu2  ;;  %v590_v35 = vpop.f32.mrf.mxu3 }
  0xf1   :  { %1244 = vmatmul.bf16.vlgmr.msra.gmra.mxu2 %v641_v32  ;;  %1257 = vmatmul.bf16.vlgmr.msra.gmra.mxu3 %v642_v33 }
  0xf2   :  { %1421 = vmatpush.bf16.msrb.mxu1 %v2023_v4 }
  0xf6   :  { %1422 = vmatpush.bf16.msrb.mxu1 %v2022_v12 }
  0xfa   :  { %1423 = vmatpush.bf16.msrb.mxu1 %v2021_v13 }
 0x13a   :  { %v1167_v38 = vpop.f32.mrf.mxu0  ;;  %v1180_v14 = vpop.f32.mrf.mxu1 }
 0x13b   :  { %v1168_v53 = vadd.f32 %v2037_v50, %v1167_v38 }
 0x13d   :  { %v1181_v58 = vadd.f32 %v1180_v14, %v1168_v53 }
 0x142   :  { %v1169_v39 = vpop.f32.mrf.mxu0  ;;  %v1182_v40 = vpop.f32.mrf.mxu1 }
 0x14a   :  { %v1219_v42 = vpop.f32.mrf.mxu0  ;;  %v1232_v43 = vpop.f32.mrf.mxu1 }
 0x152   :  { %v1221_v46 = vpop.f32.mrf.mxu0  ;;  %v1234_v47 = vpop.f32.mrf.mxu1 }
 0x164   :  { %v1193_v56 = vpop.f32.mrf.mxu2  ;;  %v1206_v57 = vpop.f32.mrf.mxu3 }
 0x165   :  { %v1194_v59 = vadd.f32 %v1193_v56, %v1181_v58 }
 0x167   :  { %v1207_v61 = vadd.f32 %v1206_v57, %v1194_v59 }
 0x169   :  { %v1220_v3 = vadd.f32 %v1219_v42, %v1207_v61 }
 0x16b   :  { %v1233_v62 = vadd.f32 %v1232_v43, %v1220_v3 }
 0x16c   :  { %v1195_v1 = vpop.f32.mrf.mxu2  ;;  %v1208_v2 = vpop.f32.mrf.mxu3 }
 0x174   :  { %v1245_v63 = vpop.f32.mrf.mxu2  ;;  %v1258_v5 = vpop.f32.mrf.mxu3 }
 0x175   :  { %v1246_v6 = vadd.f32 %v1245_v63, %v1233_v62 }
 0x177   :  { %v1259_v7 = vadd.f32 %v1258_v5, %v1246_v6 }
 0x179   :  { %v1262_v8 = vmax.f32 %v1259_v7, 0.0 }
 0x17b   :  { %1263 = vst [vmem:[#allocation10] sm:$0xff] %v1262_v8  ;;  %v1265_v9 = vpack.c.bf16 %v1262_v8, %v1262_v8 }
 0x17c   :  { %v1247_v10 = vpop.f32.mrf.mxu2  ;;  %v1260_v11 = vpop.f32.mrf.mxu3  ;;  %1440 = dma.vmem_to_hbm [thread:$0]  %s1436_s28, 128, %s1438_s8, [#allocation4]  }
 0x17d   :  { %1341 = vmatmul.bf16.vlgmr.msrb.gmra.mxu0 %v1265_v9 }
 0x1fa   :  { %v1342_v16 = vpop.f32.mrf.mxu0 }
 0x1fb   :  { %v1343_v17 = vadd.f32 %v2038_v15, %v1342_v16 }
 0x1fd   :  { %v1346_v18 = vmax.f32 %v1343_v17, 0.0 }
 0x1ff   :  { %v1348_v19 = vpack.c.bf16 %v1346_v18, %v1346_v18 }
 0x201   :  { %1424 = vmatmul.bf16.vlgmr.msrb.gmra.mxu1 %v1348_v19 }
 0x202   :  { %v1344_v20 = vpop.f32.mrf.mxu0 }
 0x27e   :  { %v1425_v22 = vpop.f32.mrf.mxu1 }
 0x27f   :  { %v1426_v23 = vadd.f32 %v2039_v21, %v1425_v22 }
 0x281   :  { %1429 = vst [vmem:[%s2322_s7] sm:$0xff] %v1426_v23 }
 0x286   :  { %v1427_v24 = vpop.f32.mrf.mxu1 }
 0x287   :  { %2166 = dma.done.wait [#allocation4], 128  }
 0x288   :  { %2167 = vsyncadd [#allocation4], 4294967168 }
 0x289   :  { %1449 = vsyncpa [#allocation3], 1 }
 0x28a   :  { %1450 = vsyncpa [#allocation6], 1 }
 0x28b   :  { %1451 = vsyncpa [#allocation9], 1 }
 0x28c   :  { %1452 = vsyncpa [#allocation4], 1 }

</bundles_post_ra>
